<compile_context>
chip_gen: v7x
topology: tpu7x:2x2x1
jax: 0.10.0
libtpu: 0.0.40
codegen_flags: <defaults>
</compile_context>

<pallas_src>
import functools

import jax
import jax.numpy as jnp
from jax.experimental import pallas as pl
from jax.experimental.pallas import tpu as pltpu

NEG_INF = -1.0e9          # stand-in for torch.finfo(dtype).min (same softmax semantics)
LN_EPS = 1e-5             # HF CLIPTextConfig.layer_norm_eps


# ----------------------------------------------------------------------- device tuning
def _vmem_capacity_bytes():
    try:
        info = pltpu.get_tpu_info()
        cap = getattr(info, "vmem_capacity_bytes", None)
        if cap:
            return int(cap)
    except Exception:
        pass
    return 64 * 1024 * 1024          # conservative (v7x-sized) fallback


VMEM_CAP = _vmem_capacity_bytes()
# v7x (64 MiB/TC): stay <= ~48 MiB; v5e/v6e (128 MiB): allow ~96 MiB.
VMEM_LIMIT = min(VMEM_CAP * 3 // 4, 100 * 1024 * 1024)
# Larger M-tiles on the big-VMEM parts; tighter on v7x so grids keep >=2 parallel steps.
TM_CAP = 1024 if VMEM_CAP >= 96 * 1024 * 1024 else 256


def _pick_tm(m):
    """Largest sublane-aligned tile <= TM_CAP that divides M, preferring >=2 grid steps."""
    for tm in (1024, 512, 256, 128, 64, 32, 16, 8):
        if tm <= TM_CAP and tm < m and m % tm == 0:
            return tm
    return m                                  # full-extent block is always legal


def _pick_tn(n):
    """Lane-dense (multiple of 128) output-column tile dividing N, else the full extent."""
    for tn in (1024, 512, 256, 128):
        if n % tn == 0:
            return tn
    return n


def _cparams(semantics):
    return pltpu.CompilerParams(dimension_semantics=semantics,
                                vmem_limit_bytes=VMEM_LIMIT)


# ----------------------------------------------------------------------------- kernels
def _ln_linear_kernel(x_ref, g_ref, bln_ref, w_ref, b_ref, o_ref, *, eps):
    """Fused LayerNorm prologue + matmul.  x tile (tm, D), weight streamed as (D, tn)."""
    x = x_ref[...].astype(jnp.float32)                          # (tm, D)
    mean = jnp.mean(x, axis=-1, keepdims=True)
    xc = x - mean
    var = jnp.mean(xc * xc, axis=-1, keepdims=True)
    h = xc * jax.lax.rsqrt(var + eps) * g_ref[...] + bln_ref[...]
    y = jnp.dot(h.astype(jnp.bfloat16), w_ref[...],             # bf16 MXU, f32 acc
                preferred_element_type=jnp.float32)
    o_ref[...] = (y + b_ref[...]).astype(o_ref.dtype)


def ln_linear(x, gamma, beta, w, b, eps=LN_EPS):
    """x: (M, D) bf16 -> LayerNorm -> x @ w + b.  Returns (M, N) bf16."""
    M, D = x.shape
    N = w.shape[1]
    tm, tn = _pick_tm(M), _pick_tn(N)
    return pl.pallas_call(
        functools.partial(_ln_linear_kernel, eps=eps),
        out_shape=jax.ShapeDtypeStruct((M, N), jnp.bfloat16),
        grid=(M // tm, N // tn),
        in_specs=[
            pl.BlockSpec((tm, D), lambda i, j: (i, 0)),
            pl.BlockSpec((1, D), lambda i, j: (0, 0)),
            pl.BlockSpec((1, D), lambda i, j: (0, 0)),
            pl.BlockSpec((D, tn), lambda i, j: (0, j)),    # weight streamed over N
            pl.BlockSpec((1, tn), lambda i, j: (0, j)),
        ],
        out_specs=pl.BlockSpec((tm, tn), lambda i, j: (i, j)),
        compiler_params=_cparams(("parallel", "parallel")),
    )(x, gamma, beta, w, b)


def _linear_residual_kernel(x_ref, w_ref, b_ref, r_ref, o_ref):
    """Fused matmul + bias + residual add.  x tile (tm, K), weight streamed as (K, tn)."""
    y = jnp.dot(x_ref[...], w_ref[...], preferred_element_type=jnp.float32)
    y = y + b_ref[...] + r_ref[...].astype(jnp.float32)
    o_ref[...] = y.astype(o_ref.dtype)


def linear_residual(x, w, b, residual):
    """x: (M, K) bf16, w: (K, N) bf16, residual: (M, N) bf16 -> (M, N) bf16."""
    M, K = x.shape
    N = w.shape[1]
    tm, tn = _pick_tm(M), _pick_tn(N)
    return pl.pallas_call(
        _linear_residual_kernel,
        out_shape=jax.ShapeDtypeStruct((M, N), jnp.bfloat16),
        grid=(M // tm, N // tn),
        in_specs=[
            pl.BlockSpec((tm, K), lambda i, j: (i, 0)),
            pl.BlockSpec((K, tn), lambda i, j: (0, j)),
            pl.BlockSpec((1, tn), lambda i, j: (0, j)),
            pl.BlockSpec((tm, tn), lambda i, j: (i, j)),
        ],
        out_specs=pl.BlockSpec((tm, tn), lambda i, j: (i, j)),
        compiler_params=_cparams(("parallel", "parallel")),
    )(x, w, b, residual)


def _mlp_kernel(x_ref, g_ref, bln_ref, w1_ref, b1_ref, w2_ref, b2_ref, o_ref,
                ln_sc, acc_sc, *, eps):
    """Fused MLP: LN2 -> fc1 + quick_gelu -> fc2 + residual.

    Grid = (M tiles, I tiles).  The (tm, ti) intermediate never touches HBM; the LN
    result is cached in a bf16 VMEM scratch and fc2 accumulates into an f32 scratch.
    """
    j = pl.program_id(1)

    @pl.when(j == 0)
    def _():
        x = x_ref[...].astype(jnp.float32)
        mean = jnp.mean(x, axis=-1, keepdims=True)
        xc = x - mean
        var = jnp.mean(xc * xc, axis=-1, keepdims=True)
        h = xc * jax.lax.rsqrt(var + eps) * g_ref[...] + bln_ref[...]
        ln_sc[...] = h.astype(jnp.bfloat16)
        acc_sc[...] = jnp.zeros_like(acc_sc)

    h1 = jnp.dot(ln_sc[...], w1_ref[...], preferred_element_type=jnp.float32)  # (tm, ti)
    h1 = h1 + b1_ref[...]
    h1 = h1 * jax.nn.sigmoid(1.702 * h1)                                       # quick_gelu
    acc_sc[...] += jnp.dot(h1.astype(jnp.bfloat16), w2_ref[...],
                           preferred_element_type=jnp.float32)                 # (tm, D)

    @pl.when(j == pl.num_programs(1) - 1)
    def _():
        y = acc_sc[...] + b2_ref[...] + x_ref[...].astype(jnp.float32)
        o_ref[...] = y.astype(o_ref.dtype)


def mlp_block(x, gamma, beta, w1, b1, w2, b2, eps=LN_EPS):
    """x: (M, D) bf16 -> LN -> fc1 + quick_gelu -> fc2 + residual, all in one kernel."""
    M, D = x.shape
    I = w1.shape[1]
    tm, ti = _pick_tm(M), _pick_tn(I)
    return pl.pallas_call(
        functools.partial(_mlp_kernel, eps=eps),
        out_shape=jax.ShapeDtypeStruct((M, D), jnp.bfloat16),
        grid=(M // tm, I // ti),
        in_specs=[
            pl.BlockSpec((tm, D), lambda i, j: (i, 0)),
            pl.BlockSpec((1, D), lambda i, j: (0, 0)),
            pl.BlockSpec((1, D), lambda i, j: (0, 0)),
            pl.BlockSpec((D, ti), lambda i, j: (0, j)),    # fc1 weight streamed over I
            pl.BlockSpec((1, ti), lambda i, j: (0, j)),
            pl.BlockSpec((ti, D), lambda i, j: (j, 0)),    # fc2 weight streamed over I
            pl.BlockSpec((1, D), lambda i, j: (0, 0)),
        ],
        out_specs=pl.BlockSpec((tm, D), lambda i, j: (i, 0)),   # resident over the I axis
        scratch_shapes=[pltpu.VMEM((tm, D), jnp.bfloat16),      # cached LN(x)
                        pltpu.VMEM((tm, D), jnp.float32)],      # fc2 accumulator
        compiler_params=_cparams(("parallel", "arbitrary")),
    )(x, gamma, beta, w1, b1, w2, b2)


def _final_ln_kernel(x_ref, g_ref, b_ref, o_ref, *, eps):
    x = x_ref[...].astype(jnp.float32)
    mean = jnp.mean(x, axis=-1, keepdims=True)
    xc = x - mean
    var = jnp.mean(xc * xc, axis=-1, keepdims=True)
    o_ref[...] = (xc * jax.lax.rsqrt(var + eps) * g_ref[...] + b_ref[...]).astype(o_ref.dtype)


def final_layer_norm(x, gamma, beta, eps=LN_EPS):
    """x: (M, D) bf16 -> (M, D) f32."""
    M, D = x.shape
    tm = _pick_tm(M)
    return pl.pallas_call(
        functools.partial(_final_ln_kernel, eps=eps),
        out_shape=jax.ShapeDtypeStruct((M, D), jnp.float32),
        grid=(M // tm,),
        in_specs=[
            pl.BlockSpec((tm, D), lambda i: (i, 0)),
            pl.BlockSpec((1, D), lambda i: (0, 0)),
            pl.BlockSpec((1, D), lambda i: (0, 0)),
        ],
        out_specs=pl.BlockSpec((tm, D), lambda i: (i, 0)),
        compiler_params=_cparams(("parallel",)),
    )(x, gamma, beta)


def _attn_kernel(q_ref, k_ref, v_ref, bias_ref, o_ref, *, head_dim, heads_per_group, bases):
    """One (batch, head-group) per grid step.  Scale already folded into the Q weights."""
    S = q_ref.shape[1]
    # additive mask built in-kernel: causal (iota compare) + padding bias (broadcast rows)
    row = jax.lax.broadcasted_iota(jnp.int32, (S, S), 0)
    col = jax.lax.broadcasted_iota(jnp.int32, (S, S), 1)
    bias = jnp.where(col > row, NEG_INF, 0.0).astype(jnp.float32) + bias_ref[0]   # (S, S)

    qb, kb, vb = bases
    outs = []
    for h in range(heads_per_group):
        q = q_ref[0, :, qb + h * head_dim: qb + (h + 1) * head_dim]   # (S, Dh) bf16
        k = k_ref[0, :, kb + h * head_dim: kb + (h + 1) * head_dim]
        v = v_ref[0, :, vb + h * head_dim: vb + (h + 1) * head_dim]
        # q·kᵀ without materializing a transpose at the JAX level: contract last dims.
        # TODO(synk): verify via pl.lower_as_mlir that Mosaic does not insert an XLU
        # transpose of k here; if it does, stage kᵀ in a small VMEM scratch per step.
        s = jax.lax.dot_general(q, k, (((1,), (1,)), ((), ())),
                                preferred_element_type=jnp.float32)   # (S, S)
        s = s + bias
        m = jnp.max(s, axis=-1, keepdims=True)
        p = jnp.exp(s - m)
        denom = jnp.sum(p, axis=-1, keepdims=True)
        out = jnp.dot(p.astype(jnp.bfloat16), v, preferred_element_type=jnp.float32)
        # reciprocal applied to the (S, Dh) output instead of the (S, S) probabilities
        outs.append(out * pl.reciprocal(denom, approx=False))
    merged = outs[0] if len(outs) == 1 else jnp.concatenate(outs, axis=-1)
    o_ref[0] = merged.astype(o_ref.dtype)                             # lane-dense group store


def attention(qkv, pad_bias, num_heads, head_dim):
    """qkv: (B, S, 3D) bf16 (columns [q|k|v], scale folded into q);
    pad_bias: (B, 1, S) f32 additive -> (B, S, D) bf16."""
    B, S, threeD = qkv.shape
    D = num_heads * head_dim

    # Pick a lane-dense head-group width (multiple of 128 and of head_dim) if possible.
    gw = None
    if D % 128 == 0:
        for cand in (128, 256, 384, 512):
            if cand % head_dim == 0 and D % cand == 0:
                gw = cand
                break

    if gw is not None:
        G = D // gw
        hpg = gw // head_dim
        q_spec = pl.BlockSpec((1, S, gw), lambda b, g: (b, 0, g))
        k_spec = pl.BlockSpec((1, S, gw), lambda b, g, G=G: (b, 0, G + g))
        v_spec = pl.BlockSpec((1, S, gw), lambda b, g, G=G: (b, 0, 2 * G + g))
        out_spec = pl.BlockSpec((1, S, gw), lambda b, g: (b, 0, g))
        bases = (0, 0, 0)
    else:
        # Small-D fallback (e.g. the demo config): one group, full fused-qkv block.
        G, hpg, gw = 1, num_heads, D
        full = pl.BlockSpec((1, S, threeD), lambda b, g: (b, 0, 0))
        q_spec = k_spec = v_spec = full
        out_spec = pl.BlockSpec((1, S, D), lambda b, g: (b, 0, 0))
        bases = (0, D, 2 * D)

    return pl.pallas_call(
        functools.partial(_attn_kernel, head_dim=head_dim,
                          heads_per_group=hpg, bases=bases),
        out_shape=jax.ShapeDtypeStruct((B, S, D), jnp.bfloat16),
        grid=(B, G),
        in_specs=[q_spec, k_spec, v_spec,
                  pl.BlockSpec((1, 1, S), lambda b, g: (b, 0, 0))],
        out_specs=out_spec,
        compiler_params=_cparams(("parallel", "parallel")),
    )(qkv, qkv, qkv, pad_bias)


# ----------------------------------------------------------------------------- params
def init_params(key, cfg):
    V, D, I = cfg["vocab"], cfg["hidden"], cfg["inter"]
    L, P, H = cfg["layers"], cfg["max_pos"], cfg["heads"]
    scale = (D // H) ** -0.5

    def nrm(k, shape):
        return 0.02 * jax.random.normal(k, shape, jnp.float32)

    keys = jax.random.split(key, 2 + 4 * L)
    params = {
        "token_embedding": nrm(keys[0], (V, D)),
        "position_embedding": nrm(keys[1], (P, D)),
        "final_ln_g": jnp.ones((1, D), jnp.float32),
        "final_ln_b": jnp.zeros((1, D), jnp.float32),
        "layers": [],
    }
    for l in range(L):
        kqkv, ko, k1, k2 = keys[2 + 4 * l: 2 + 4 * (l + 1)]
        qkv_w = nrm(kqkv, (D, 3 * D))
        # Fold the attention scale 1/sqrt(Dh) into the Q projection (weight; the q bias
        # would also be scaled if nonzero) — removes an (S,S) multiply per head in-kernel.
        qkv_w = qkv_w.at[:, :D].multiply(scale)
        params["layers"].append({
            "ln1_g": jnp.ones((1, D), jnp.float32), "ln1_b": jnp.zeros((1, D), jnp.float32),
            "qkv_w": qkv_w.astype(jnp.bfloat16), "qkv_b": jnp.zeros((1, 3 * D), jnp.float32),
            "o_w": nrm(ko, (D, D)).astype(jnp.bfloat16), "o_b": jnp.zeros((1, D), jnp.float32),
            "ln2_g": jnp.ones((1, D), jnp.float32), "ln2_b": jnp.zeros((1, D), jnp.float32),
            "fc1_w": nrm(k1, (D, I)).astype(jnp.bfloat16), "fc1_b": jnp.zeros((1, I), jnp.float32),
            "fc2_w": nrm(k2, (I, D)).astype(jnp.bfloat16), "fc2_b": jnp.zeros((1, D), jnp.float32),
        })
    return params


# ----------------------------------------------------------------------------- forward
def clip_text_forward(params, input_ids, attention_mask, cfg):
    B, S_in = input_ids.shape
    D, H = cfg["hidden"], cfg["heads"]
    Dh = D // H

    # pad sequence to a sublane multiple; pad positions neutralized via the additive mask
    S = ((S_in + 7) // 8) * 8
    if attention_mask is None:
        attention_mask = jnp.ones((B, S_in), jnp.int32)
    if S != S_in:
        pad = S - S_in
        input_ids = jnp.pad(input_ids, ((0, 0), (0, pad)))
        attention_mask = jnp.pad(attention_mask, ((0, 0), (0, pad)))

    # --- embeddings (token gather + position add), bf16 residual stream ---------------
    tok = jnp.take(params["token_embedding"], input_ids.reshape(-1), axis=0)   # (B*S, D)
    pos = params["position_embedding"][:S]
    x = (tok.reshape(B, S, D) + pos[None]).reshape(B * S, D).astype(jnp.bfloat16)

    # padding bias only; the causal part is built inside the attention kernel
    pad_bias = ((1.0 - attention_mask.astype(jnp.float32)) * NEG_INF).reshape(B, 1, S)

    # --- encoder layers (pre-LN transformer, quick_gelu MLP) --------------------------
    # TODO(synk): cross-pallas_call DMA future to prefetch the next layer's weights
    # behind the attention call (v6e item); relies on semaphore-typed outputs.
    for lyr in params["layers"]:
        qkv = ln_linear(x, lyr["ln1_g"], lyr["ln1_b"], lyr["qkv_w"], lyr["qkv_b"])
        attn = attention(qkv.reshape(B, S, 3 * D), pad_bias, H, Dh)
        x = linear_residual(attn.reshape(B * S, D), lyr["o_w"], lyr["o_b"], x)
        x = mlp_block(x, lyr["ln2_g"], lyr["ln2_b"],
                      lyr["fc1_w"], lyr["fc1_b"], lyr["fc2_w"], lyr["fc2_b"])

    encoder_last_hidden_state = x.astype(jnp.float32).reshape(B, S, D)[:, :S_in]
    last_hidden_state = final_layer_norm(
        x, params["final_ln_g"], params["final_ln_b"]).reshape(B, S, D)[:, :S_in]

    # matches wrapper's `(final_layer_norm(last), *encoder_outputs)` with return_dict=False
    return last_hidden_state, encoder_last_hidden_state


# ----------------------------------------------------------------------------- main
if __name__ == "__main__":
    cfg = dict(vocab=48, hidden=32, heads=2, inter=64, layers=2, max_pos=16)
    B, S = 2, 8

    key = jax.random.PRNGKey(0)
    k_param, k_ids = jax.random.split(key)

    params = init_params(k_param, cfg)
    input_ids = jax.random.randint(k_ids, (B, S), 0, cfg["vocab"], dtype=jnp.int32)
    attention_mask = jnp.ones((B, S), dtype=jnp.int32).at[1, 6:].set(0)  # pad last 2 of row 1

    last_hidden, encoder_last = clip_text_forward(params, input_ids, attention_mask, cfg)
    jax.block_until_ready((last_hidden, encoder_last))

    assert last_hidden.shape == (B, S, cfg["hidden"])
    assert encoder_last.shape == (B, S, cfg["hidden"])
    assert bool(jnp.all(jnp.isfinite(last_hidden)))
    assert bool(jnp.all(jnp.isfinite(encoder_last)))
    print("KERNEL_OK")
</pallas_src>

<mosaic_0001>
module attributes {stable_mosaic.version = 11 : i64} {
  func.func @_ln_linear_kernel(%arg0: i32, %arg1: i32, %arg2: memref<8x32xbf16, #tpu.memory_space<vmem>>, %arg3: memref<1x32xf32, #tpu.memory_space<vmem>>, %arg4: memref<1x32xf32, #tpu.memory_space<vmem>>, %arg5: memref<32x96xbf16, #tpu.memory_space<vmem>>, %arg6: memref<1x96xf32, #tpu.memory_space<vmem>>, %arg7: memref<8x96xbf16, #tpu.memory_space<vmem>>) attributes {dimension_semantics = [#tpu.dimension_semantics<parallel>, #tpu.dimension_semantics<parallel>], iteration_bounds = array<i64: 2, 1>, scalar_prefetch = 0 : i64, scratch_operands = 0 : i64, tpu.core_type = #tpu.core_type<tc>, window_params = [{transform_indices = @transform_0, window_bounds = array<i64: 8, 32>}, {pipeline_mode = #tpu.pipeline_mode<synchronous>, transform_indices = @transform_1, window_bounds = array<i64: 1, 32>}, {pipeline_mode = #tpu.pipeline_mode<synchronous>, transform_indices = @transform_2, window_bounds = array<i64: 1, 32>}, {transform_indices = @transform_3, window_bounds = array<i64: 32, 96>}, {transform_indices = @transform_4, window_bounds = array<i64: 1, 96>}, {transform_indices = @transform_5, window_bounds = array<i64: 8, 96>}]} {
    %c0 = arith.constant 0 : index
    %c0_0 = arith.constant 0 : index
    %0 = vector.load %arg2[%c0, %c0_0] : memref<8x32xbf16, #tpu.memory_space<vmem>>, vector<8x32xbf16>
    %1 = arith.extf %0 : vector<8x32xbf16> to vector<8x32xf32>
    %cst = arith.constant dense<0.000000e+00> : vector<8xf32>
    %2 = vector.multi_reduction <add>, %1, %cst [1] : vector<8x32xf32> to vector<8xf32>
    %3 = vector.shape_cast %2 : vector<8xf32> to vector<8x1xf32>
    %cst_1 = arith.constant 3.200000e+01 : f32
    %4 = vector.broadcast %cst_1 : f32 to vector<8x1xf32>
    %5 = arith.divf %3, %4 : vector<8x1xf32>
    %6 = vector.broadcast %5 : vector<8x1xf32> to vector<8x32xf32>
    %7 = arith.subf %1, %6 : vector<8x32xf32>
    %8 = arith.mulf %7, %7 : vector<8x32xf32>
    %cst_2 = arith.constant dense<0.000000e+00> : vector<8xf32>
    %9 = vector.multi_reduction <add>, %8, %cst_2 [1] : vector<8x32xf32> to vector<8xf32>
    %10 = vector.shape_cast %9 : vector<8xf32> to vector<8x1xf32>
    %cst_3 = arith.constant 3.200000e+01 : f32
    %11 = vector.broadcast %cst_3 : f32 to vector<8x1xf32>
    %12 = arith.divf %10, %11 : vector<8x1xf32>
    %cst_4 = arith.constant 9.99999974E-6 : f32
    %13 = vector.broadcast %cst_4 : f32 to vector<8x1xf32>
    %14 = arith.addf %12, %13 : vector<8x1xf32>
    %15 = math.rsqrt %14 : vector<8x1xf32>
    %16 = vector.broadcast %15 : vector<8x1xf32> to vector<8x32xf32>
    %17 = arith.mulf %7, %16 : vector<8x32xf32>
    %c0_5 = arith.constant 0 : index
    %c0_6 = arith.constant 0 : index
    %18 = vector.load %arg3[%c0_5, %c0_6] : memref<1x32xf32, #tpu.memory_space<vmem>>, vector<1x32xf32>
    %19 = vector.broadcast %18 : vector<1x32xf32> to vector<8x32xf32>
    %20 = arith.mulf %17, %19 : vector<8x32xf32>
    %c0_7 = arith.constant 0 : index
    %c0_8 = arith.constant 0 : index
    %21 = vector.load %arg4[%c0_7, %c0_8] : memref<1x32xf32, #tpu.memory_space<vmem>>, vector<1x32xf32>
    %22 = vector.broadcast %21 : vector<1x32xf32> to vector<8x32xf32>
    %23 = arith.addf %20, %22 : vector<8x32xf32>
    %24 = arith.truncf %23 : vector<8x32xf32> to vector<8x32xbf16>
    %c0_9 = arith.constant 0 : index
    %c0_10 = arith.constant 0 : index
    %25 = vector.load %arg5[%c0_9, %c0_10] : memref<32x96xbf16, #tpu.memory_space<vmem>>, vector<32x96xbf16>
    %cst_11 = arith.constant dense<0.000000e+00> : vector<8x96xf32>
    %26 = tpu.matmul %24, %25, %cst_11 {dimension_numbers = #tpu.dot_dimension_numbers<[1], [0], [0], [1], [0, 0, 1, 1], [], []>} : vector<8x32xbf16>, vector<32x96xbf16>, vector<8x96xf32> -> vector<8x96xf32>
    %c0_12 = arith.constant 0 : index
    %c0_13 = arith.constant 0 : index
    %27 = vector.load %arg6[%c0_12, %c0_13] : memref<1x96xf32, #tpu.memory_space<vmem>>, vector<1x96xf32>
    %28 = vector.broadcast %27 : vector<1x96xf32> to vector<8x96xf32>
    %29 = arith.addf %26, %28 : vector<8x96xf32>
    %30 = arith.truncf %29 : vector<8x96xf32> to vector<8x96xbf16>
    %c0_14 = arith.constant 0 : index
    %c0_15 = arith.constant 0 : index
    %31 = vector.load %arg7[%c0_14, %c0_15] : memref<8x96xbf16, #tpu.memory_space<vmem>>, vector<8x96xbf16>
    tpu.vector_store %arg7[%c0_14, %c0_15], %30 {strides = array<i32>} : memref<8x96xbf16, #tpu.memory_space<vmem>>, vector<8x96xbf16>,
    return
  }
  func.func @transform_0(%arg0: i32, %arg1: i32) -> (i32, i32) {
    %c0_i32 = arith.constant 0 : i32
    %c0_i32_0 = arith.constant 0 : i32
    return %arg0, %c0_i32 : i32, i32
  }
  func.func @transform_1(%arg0: i32, %arg1: i32) -> (i32, i32) {
    %c0_i32 = arith.constant 0 : i32
    %c0_i32_0 = arith.constant 0 : i32
    %c0_i32_1 = arith.constant 0 : i32
    return %c0_i32, %c0_i32_0 : i32, i32
  }
  func.func @transform_2(%arg0: i32, %arg1: i32) -> (i32, i32) {
    %c0_i32 = arith.constant 0 : i32
    %c0_i32_0 = arith.constant 0 : i32
    %c0_i32_1 = arith.constant 0 : i32
    return %c0_i32, %c0_i32_0 : i32, i32
  }
  func.func @transform_3(%arg0: i32, %arg1: i32) -> (i32, i32) {
    %c0_i32 = arith.constant 0 : i32
    %c0_i32_0 = arith.constant 0 : i32
    return %c0_i32, %arg1 : i32, i32
  }
  func.func @transform_4(%arg0: i32, %arg1: i32) -> (i32, i32) {
    %c0_i32 = arith.constant 0 : i32
    %c0_i32_0 = arith.constant 0 : i32
    return %c0_i32, %arg1 : i32, i32
  }
  func.func @transform_5(%arg0: i32, %arg1: i32) -> (i32, i32) {
    %c0_i32 = arith.constant 0 : i32
    return %arg0, %arg1 : i32, i32
  }
}

</mosaic_0001>

<bundles_post_ra>
// kernel: tpu_custom_call.1
= control target key start
LH: loop header
LB: loop body
LE: loop exit
PB: predicated region body
PF: predicated region fallthrough
CT: control target
= control target key end

     0   :  { %10 = vsyncpa [#allocation3], 0  ;;  %s1039_s0 = inlined_call_operand.hbm [shape: bf16[16,32], index: 0, kind: input, shape index: {}]   ;;  %s1040_s1 = inlined_call_operand.vmem [shape: f32[1,32], index: 1, kind: input, shape index: {}]   ;;  %s1041_s2 = inlined_call_operand.vmem [shape: f32[1,32], index: 2, kind: input, shape index: {}]   ;;  %s1042_s3 = inlined_call_operand.hbm [shape: bf16[32,96], index: 3, kind: input, shape index: {}]   ;;  %s1043_s4 = inlined_call_operand.vmem [shape: f32[1,96], index: 4, kind: input, shape index: {}]   ;;  %s1044_s5 = inlined_call_operand.hbm [shape: bf16[16,96], index: 5, kind: output, shape index: {}]  }
   0x1   :  { %12 = vsyncpa [#allocation3 + $0x1], 0 }
   0x2   :  { %13 = vsyncpa [#allocation6], 0 }
   0x3   :  { %14 = vsyncpa [#allocation4], 0 }
   0x4   :  { %16 = vsyncpa [#allocation4 + $0x1], 0  ;;  %s809_s18 = smov 0   ;;  %s811_s19 = smov 0  }
   0x5   :  { %s813_s20 = smov 0   ;;  %s815_s21 = smov 0  }
   0x6   :  { %s817_s22 = smov 0   ;;  %s819_s23 = smov 0  }
   0x7 LB: > { %s512_s24 = sadd.s32 4294967295, %s770_s23   ;;  %s513_s25 = sadd.s32 4294967294, %s770_s23   ;;  %s770_s23 = sphi %s819_s23, %s22_s23   ;;  %s766_s22 = sphi %s817_s22, %s1068_s22   ;;  %s762_s21 = sphi %s815_s21, %s1067_s21   ;;  %s758_s20 = sphi %s813_s20, %s1066_s20   ;;  %s754_s19 = sphi %s811_s19, %s1065_s19   ;;  %s750_s18 = sphi %s809_s18, %s1064_s18  }
   0x8   : > { %p54_p0 = scmp.ne.s32.totalorder %s754_s19, %s750_s18  ;;  %p843_p1 = scmp.eq.s32.totalorder %s512_s24, 0 }
   0x9   : > { %p847_p2 = scmp.eq.s32.totalorder %s512_s24, 1  ;;  %p180_p3 = scmp.eq.s32.totalorder %s513_s25, 1 }
   0xa   : > { %s1049_s26 = scalar_select %p843_p1, 1, 0 }
   0xb   : > { %s1050_s27 = scalar_select %p847_p2, 1, 0 }
   0xc   : > { %p853_p4 = por %p843_p1, %p54_p0  ;;  %p514_p5 = scmp.ge.s32.totalorder %s770_s23, 1 }
   0xd   : > { %p858_p6 = por %p180_p3, %p54_p0  ;;  %p187_p7 = scmp.lt.s32.totalorder %s770_s23, 3 }
   0xe   : > { %s1051_s28 = scalar_select %p853_p4, 1, 0 }
   0xf   : > { %s1052_s29 = scalar_select %p858_p6, 1, 0 }
  0x10   : > { %p863_p8 = pnand %p514_p5, %p187_p7  ;;  %s772_s6 = smov [#allocation5]  }
  0x11   : > { %s207_s7 = sshll.u32 %s772_s6, 4  ;;  %s34_s9 = sadd.s32 1, %s766_s22  ;;  %s208_s7 = int_to_ptr.vmem [resolvable:$true] %s207_s7 }
  0x12   : > { %s1053_s30 = scalar_select %p863_p8, 1, 0 }
  0x13   : > { %p553_p9 = pneg %p863_p8  ;;  %s626_s12 = scalar_lea.hbm %s1042_s3, 256 }
  0x14   : > { %p627_p12 = scmp.ne.s32.totalorder %s1042_s3, %s626_s12  ;;  %p633_p5 = scmp.lt.u32.totalorder %s626_s12, %s1042_s3 }
  0x15   : > { %p872_p11 = pnand %p553_p9, %p843_p1 }
  0x17   : > { %p628_p13 = pneg %p872_p11 }
  0x19   : > { %p629_p0 = pnand %p628_p13, %p627_p12 }
  0x1b   : > { %p630_p3 = pneg %p629_p0 }
  0x1d   : > { %p635_p7 = pnand %p633_p5, %p630_p3 }
  0x1f   : > { %638 = shalt.err (!%p635_p7)
}
  0x20   : > { %s639_s17 = scalar_lea.vmem %s208_s7, 256  ;;  %p647_p1 = scmp.lt.s32.totalorder %s208_s7, %s208_s7 }
  0x21   : > { %p640_p9 = scmp.ne.s32.totalorder %s208_s7, %s639_s17  ;;  %p648_p4 = scmp.lt.s32.totalorder %s639_s17, %s639_s17 }
  0x23   : > { %p642_p10 = pnand %p640_p9, %p628_p13  ;;  %p649_p8 = por %p648_p4, %p647_p1 }
  0x25   : > { %p643_p6 = pneg %p642_p10 }
  0x27   : > { %p650_p2 = pnand %p649_p8, %p643_p6 }
  0x29   : > { %653 = shalt.err (!%p650_p2)
}
  0x2a   : > { %s773_s24 = smov 64   ;;  %s774_s25 = smov 4  }
  0x2b   : > { %556 = dma.hbm_to_vmem [thread:$0]  (!%p872_p11), %s1042_s3, 256, %s208_s7, [#allocation6], %s773_s24, %s773_s24, %s774_s25  }
  0x2c   : > { %p36_p1 = scmp.ge.s32.totalorder %s34_s9, 2  ;;  %s41_s11 = sadd.s32 1, %s758_s20 }
  0x2d   : > { %p48_p2 = scmp.ne.s32.totalorder %s758_s20, %s754_s19  ;;  %p49_p4 = scmp.eq.s32.totalorder %s770_s23, 0 }
  0x2e   : > { %s1070_s9 = smov (%p36_p1, %s34_s9), 0  ;;  %p1056_p8 = scmp.ne.s32.totalorder %s1050_s27, 0 }
  0x2f   : > { %p899_p6 = por %p49_p4, %p48_p2  ;;  %s38_s8 = ssub.s32 %s766_s22, %s1070_s9 }
  0x30   : > { %p905_p10 = por %p1056_p8, %p48_p2  ;;  %p566_p12 = scmp.lt.s32.totalorder %s770_s23, 2 }
  0x31   : > { %p39_p11 = scmp.eq.s32.totalorder %s38_s8, 0  ;;  %s227_s7 = sand.u32 1, %s758_s20  }
  0x32   : > { %s518_s14 = sshll.u32 %s227_s7, 2  ;;  %s519_s16 = sshll.u32 %s766_s22, 6 }
  0x33   : > { %s914_s15 = scalar_select %p39_p11, %s758_s20, %s41_s11  }
  0x34   : > { %s920_s25 = scalar_lea.hbm %s1039_s0, %s519_s16  ;;  %s231_s27 = scalar_lea.vmem [#allocation2], %s518_s14 }
  0x35   : > { %s238_s6 = sshll.u32 %s231_s27, 4  ;;  %p926_p13 = pnand %p566_p12, %p899_p6  ;;  %s922_s6 = int_to_ptr.vmem [resolvable:$true] %s238_s6 }
  0x36   : > { %s228_s11 = scalar_lea.sflag [#allocation3], %s227_s7  ;;  %s654_s8 = scalar_lea.hbm %s920_s25, 64 }
  0x37   : > { %p655_p0 = scmp.ne.s32.totalorder %s920_s25, %s654_s8  ;;  %p656_p3 = pneg %p926_p13 }
  0x38   : > { %s659_s17 = scalar_lea.hbm %s1039_s0, 128  ;;  %p660_p9 = scmp.lt.u32.totalorder %s920_s25, %s1039_s0 }
  0x39   : > { %p657_p5 = pnand %p656_p3, %p655_p0  ;;  %p661_p1 = scmp.lt.u32.totalorder %s659_s17, %s654_s8 }
  0x3a   : > { %p663_p4 = scmp.lt.u32.totalorder %s654_s8, %s920_s25 }
  0x3b   : > { %p658_p7 = pneg %p657_p5  ;;  %p662_p2 = por %p661_p1, %p660_p9 }
  0x3d   : > { %p664_p6 = por %p663_p4, %p662_p2 }
  0x3f   : > { %p665_p8 = pnand %p664_p6, %p658_p7 }
  0x41   : > { %668 = shalt.err (!%p665_p8)
}
  0x42   : > { %s669_s7 = scalar_lea.vmem %s922_s6, 64  ;;  %s775_s27 = smov [#allocation2]  }
  0x43   : > { %p670_p12 = scmp.ne.s32.totalorder %s922_s6, %s669_s7  ;;  %s674_s14 = sshll.u32 %s775_s27, 4  ;;  %s675_s14 = int_to_ptr.vmem [resolvable:$false] %s674_s14 }
  0x44   : > { %s676_s16 = scalar_lea.vmem %s675_s14, 128  ;;  %p677_p5 = scmp.lt.s32.totalorder %s922_s6, %s675_s14 }
  0x45   : > { %p672_p11 = pnand %p670_p12, %p656_p3  ;;  %p678_p9 = scmp.lt.s32.totalorder %s676_s16, %s669_s7 }
  0x47   : > { %p673_p0 = pneg %p672_p11  ;;  %p679_p1 = por %p678_p9, %p677_p5 }
  0x49   : > { %p680_p2 = pnand %p679_p1, %p673_p0 }
  0x4b   : > { %683 = shalt.err (!%p680_p2)
}
  0x4c   : > { %560 = dma.hbm_to_vmem [thread:$0]  (!%p926_p13), %s920_s25, 64, %s922_s6, %s228_s11  }
  0x4d   : > { %p1059_p7 = scmp.ne.s32.totalorder %s1053_s30, 0 }
  0x4e   : > { %s958_s8 = sand.u32 (!%p1059_p7), 1, %s754_s19   ;;  %p1060_p3 = scmp.ne.s32.totalorder (!%p1059_p7), %s1051_s28, 0 }
  0x4f   : > { %247 = sbr.rel (%p1059_p7) target bundleno = 638 (0x27e), region = 40  ;;  %s521_s17 = sshll.u32 (!%p1059_p7), %s958_s8, 2 }
  0x50   : > { %s250_s12 = scalar_lea.sflag (!%p1059_p7), [#allocation3], %s958_s8  ;;  %s253_s24 = scalar_lea.vmem (!%p1059_p7), [#allocation2], %s521_s17 }
  0x56   : > { %737 = dma.done.wait (%p1060_p3), %s250_s12, 64  }
  0x57   : > { %739 = vsyncadd (%p1060_p3), %s250_s12, 4294967232  ;;  %p1061_p13 = scmp.ne.s32.totalorder %s1049_s26, 0 }
  0x59   : > { %741 = dma.done.wait (%p1061_p13), [#allocation6], 256  }
  0x5a   : > { %743 = vsyncadd (%p1061_p13), [#allocation6], 4294967040  ;;  %vm293_vm0 = vcmask 261120   ;;  %v291_v0 = vld [vmem:[%s253_s24] sm:$0xf]  ;;  %v622_v8 = vld [vmem:[#allocation5] sm:$0xff]  }
  0x5b   : > { %v292_v1 = vunpack.c.l.bf16 %v291_v0  ;;  %v776_v9 = vmov 0.0   ;;  %v623_v10 = vld [vmem:[#allocation5 + $0x8] sm:$0xff]   ;;  %vm777_vm1 = vmmov 0   ;;  %v524_v15 = vld [vmem:[%s1040_s1] ss:$0 sm:$0xff]  ;;  %s531_s11 = sshll.u32 %s762_s21, 6 }
  0x5c   : > { %537 = vmatprep.subr.bf16.mxu0 %v776_v9  ;;  %541 = vmatprep.mubr.msk.bf16.mxu0 %vm777_vm1, %v776_v9  ;;  %v525_v17 = vld [vmem:[%s1041_s2] ss:$0 sm:$0xff]  ;;  %s286_s7 = scalar_lea.vmem [#allocation7], %s521_s17  ;;  %vm392_vm2 = vcmask 781312   ;;  %s990_s12 = scalar_lea.hbm %s1044_s5, %s531_s11 }
  0x5d   : > { %v294_v2 = vsel %vm293_vm0, %v292_v1, 0.0  ;;  %538 = vmatpush3.bf16.msra.mxu0 %v622_v8  ;;  %v526_v21 = vld [vmem:[%s1043_s4] ss:$0 sm:$0xff]  ;;  %s409_s27 = sshll.u32 %s286_s7, 4  ;;  %s395_s21 = scalar_lea.sflag [#allocation4], %s958_s8  ;;  %s992_s27 = int_to_ptr.vmem [resolvable:$true] %s409_s27 }
  0x5e   : > { %295 = vadd.xlane.f32.xlu0 %v294_v2  ;;  %539 = vmatprep.subr.bf16.mxu0 %v776_v9  ;;  %s684_s17 = scalar_lea.vmem %s992_s27, 64  ;;  %s778_s24 = smov [#allocation7]  }
  0x5f   : > { %p685_p4 = scmp.ne.s32.totalorder %s992_s27, %s684_s17  ;;  %s688_s26 = sshll.u32 %s778_s24, 4  ;;  %s689_s26 = int_to_ptr.vmem [resolvable:$false] %s688_s26 }
  0x60   : > { %s690_s28 = scalar_lea.vmem %s689_s26, 128  ;;  %p691_p12 = scmp.lt.s32.totalorder %s992_s27, %s689_s26 }
  0x61   : > { %540 = vmatpush3.bf16.msra.mxu0 %v623_v10  ;;  %p686_p6 = pnand %p685_p4, %p905_p10  ;;  %p692_p11 = scmp.lt.s32.totalorder %s690_s28, %s684_s17 }
  0x63   : > { %p687_p8 = pneg %p686_p6  ;;  %p693_p0 = por %p692_p11, %p691_p12 }
  0x65   : > { %p694_p5 = pnand %p693_p0, %p687_p8 }
  0xeb   : > { %v296_v3 = vpop.xlane.xlu0 %295 }
  0xec   : > { %v298_v4 = vmul.f32 0.03125, %v296_v3 }
  0xee   : > { %v299_v5 = vsub.f32 %v292_v1, %v298_v4 }
  0xf0   : > { %v300_v6 = vmul.f32 %v299_v5, %v299_v5 }
  0xf2   : > { %v301_v7 = vsel %vm293_vm0, %v300_v6, 0.0 }
  0xf3   : > { %302 = vadd.xlane.f32.xlu0 %v301_v7 }
 0x180   : > { %v303_v11 = vpop.xlane.xlu0 %302 }
 0x181   : > { %v304_v12 = vmul.f32 0.03125, %v303_v11 }
 0x183   : > { %v305_v13 = vadd.f32 1e-05, %v304_v12 }
 0x185   : > { %624 = vrsqrt.f32 %v305_v13 }
 0x18f   : > { %v625_v14 = vpop.eup %624 }
 0x190   : > { %v307_v16 = vmul.f32 %v625_v14, %v299_v5 }
 0x192   : > { %v315_v18 = vmul.f32 %v524_v15, %v307_v16 }
 0x194   : > { %v323_v19 = vadd.f32 %v525_v17, %v315_v18 }
 0x196   : > { %v324_v20 = vpack.c.bf16 %v323_v19, %v323_v19 }
 0x198   : > { %542 = vmatmul.mubr.msk.bf16.vlgmr.msra.gmra.mrb[0].mxu0 %vm293_vm0, %v324_v20 }
 0x26b   : > { %v385_v22 = vpop.f32.mrb[0].mxu0 }
 0x26c   : > { %v386_v23 = vadd.f32 %v526_v21, %v385_v22  ;;  %v543_v24 = vpop.f32.mrb[1].mxu0 }
 0x26d   : > { %v388_v25 = vpop.f32.mrb[2].mxu0 }
 0x26e   : > { %v391_v26 = vpack.c.bf16 %v386_v23, %v386_v23  ;;  %v544_v27 = vpop.f32.mrb[3].mxu0 }
 0x270   : > { %393 = vst.msk [vmem:[%s286_s7] sm:$0xf] %vm392_vm2, %v391_v26 }
 0x271   : > { %697 = shalt.err (!%p694_p5)
}
 0x272   : > { %s698_s8 = scalar_lea.hbm %s990_s12, 64  ;;  %s702_s6 = scalar_lea.hbm %s1044_s5, 128 }
 0x273   : > { %p699_p9 = scmp.ne.s32.totalorder %s990_s12, %s698_s8  ;;  %p703_p7 = scmp.lt.u32.totalorder %s990_s12, %s1044_s5 }
 0x274   : > { %p704_p3 = scmp.lt.u32.totalorder %s702_s6, %s698_s8  ;;  %p706_p4 = scmp.lt.u32.totalorder %s698_s8, %s990_s12 }
 0x275   : > { %p700_p1 = pnand %p699_p9, %p905_p10 }
 0x276   : > { %p705_p13 = por %p704_p3, %p703_p7 }
 0x277   : > { %p701_p2 = pneg %p700_p1 }
 0x278   : > { %p707_p6 = por %p706_p4, %p705_p13 }
 0x27a   : > { %p708_p8 = pnand %p707_p6, %p701_p2 }
 0x27c   : > { %711 = shalt.err (!%p708_p8)
}
 0x27d   : > { %551 = dma.vmem_to_hbm [thread:$0]  (%p905_p10), %s992_s27, 64, %s990_s12, %s395_s21  }
 0x27e PF: > { %s421_s7 = sand.u32 1, %s750_s18   ;;  %p1062_p12 = scmp.ne.s32.totalorder %s1052_s29, 0 }
 0x27f   : > { %p1063_p11 = scmp.ge.s32.totalorder %s770_s23, 2  ;;  %s422_s14 = scalar_lea.sflag [#allocation4], %s421_s7 }
 0x281   : > { %p562_p0 = pnand %p1063_p11, %p1062_p12 }
 0x283   : > { %745 = dma.done.wait (!%p562_p0), %s422_s14, 64  }
 0x284   : > { %747 = vsyncadd (!%p562_p0), %s422_s14, 4294967232  ;;  %s22_s23 = sadd.s32 1, %s770_s23   ;;  %s1064_s18 = smov %s754_s19 }
 0x285   : > { %p19_p5 = scmp.ge.s32.totalorder %s22_s23, 4   ;;  %s1065_s19 = smov %s758_s20 }
 0x286   : > { %s1066_s20 = smov %s914_s15  ;;  %s1067_s21 = smov %s766_s22 }
 0x287   : > { %s1068_s22 = smov %s1070_s9  ;;  %21 = sbr.rel (!%p19_p5) target bundleno = 7 (0x7), region = 93 }
 0x28e   :  { %427 = vsyncpa [#allocation3], 1 }
 0x28f   :  { %429 = vsyncpa [#allocation3 + $0x1], 1 }
 0x290   :  { %430 = vsyncpa [#allocation6], 1 }
 0x291   :  { %431 = vsyncpa [#allocation4], 1 }
 0x292   :  { %433 = vsyncpa [#allocation4 + $0x1], 1 }

</bundles_post_ra>
